<compile_context>
chip_gen: v7x
topology: tpu7x:2x2x1
jax: 0.10.0
libtpu: 0.0.40
codegen_flags: <defaults>
</compile_context>

<pallas_src>
import functools

import jax
import jax.numpy as jnp
from jax.experimental import pallas as pl
from jax.experimental.pallas import tpu as pltpu

_LANE = 128                         # vreg lane width; column tiles are multiples
_SUBLANE = 8                        # row tiles (two-pass path) are multiples
_MAX_TILE_C = 8192                  # diminishing returns past this
_VMEM_LIMIT_CAP = 32 * 1024 * 1024  # safe on every generation incl. v7x (64 MiB)


# -----------------------------------------------------------------------------
# Kernels
# -----------------------------------------------------------------------------
def _softmax_dim0_kernel(x_ref, o_ref):
    """Single-pass: the full reduction axis (dim0) is resident in the block."""
    x = x_ref[...].astype(jnp.float32)            # one-shot upcast (bf16 / v5e)
    ex = jnp.exp(x)                               # EUP
    denom = jnp.sum(ex, axis=0, keepdims=True)    # XLU sublane reduce, f32 accum
    inv = pl.reciprocal(denom, approx=True)       # EUP vrcp (free slot)
    o_ref[...] = (ex * inv).astype(o_ref.dtype)


def _softmax_dim0_two_pass_kernel(x_ref, o_ref, denom_ref, *, n_row_tiles):
    """Two-pass path for tall matrices.

    Trailing grid axis runs 2 * n_row_tiles steps per column tile:
      steps [0, n_row_tiles)              accumulate sum(exp) into denom_ref
      steps [n_row_tiles, 2*n_row_tiles)  recompute exp, write output
    """
    t = pl.program_id(1)

    @pl.when(t == 0)
    def _():
        denom_ref[...] = jnp.zeros_like(denom_ref)

    ex = jnp.exp(x_ref[...].astype(jnp.float32))

    @pl.when(t < n_row_tiles)
    def _():
        denom_ref[...] += jnp.sum(ex, axis=0, keepdims=True)

    @pl.when(t >= n_row_tiles)
    def _():
        inv = pl.reciprocal(denom_ref[...], approx=True)
        o_ref[...] = (ex * inv).astype(o_ref.dtype)


# -----------------------------------------------------------------------------
# Tiling helpers
# -----------------------------------------------------------------------------
def _pick_col_tile(c, max_cols):
    """Largest legal column tile <= max_cols.

    Legal tiles: the full width c itself (single block over columns), or a
    multiple-of-128 divisor of c. Returns None if nothing legal fits.
    """
    if c <= max_cols:
        return c
    if c % _LANE != 0:
        return None
    t = (max_cols // _LANE) * _LANE
    while t >= _LANE:
        if c % t == 0:
            return t
        t -= _LANE
    return None


def _vmem_limit(per_step_bytes):
    # per_step_bytes already includes double-buffering + f32 temporaries;
    # add 50% headroom, keep within a cap that is safe on v7x's 64 MiB VMEM.
    return int(min(_VMEM_LIMIT_CAP, max(8 << 20, int(per_step_bytes * 1.5))))


# -----------------------------------------------------------------------------
# Wrappers
# -----------------------------------------------------------------------------
def _softmax_single_pass(x, tile_c, per_col_bytes):
    n, c = x.shape
    return pl.pallas_call(
        _softmax_dim0_kernel,
        out_shape=jax.ShapeDtypeStruct((n, c), x.dtype),
        grid_spec=pltpu.PrefetchScalarGridSpec(
            num_scalar_prefetch=0,
            grid=(c // tile_c,),
            in_specs=[pl.BlockSpec((n, tile_c), lambda j: (0, j))],
            out_specs=pl.BlockSpec((n, tile_c), lambda j: (0, j)),
        ),
        compiler_params=pltpu.CompilerParams(
            dimension_semantics=("parallel",),
            vmem_limit_bytes=_vmem_limit(per_col_bytes * tile_c),
        ),
    )(x)


def _softmax_two_pass(x, tile_n, tile_c, per_step_bytes):
    n, c = x.shape
    n_row_tiles = n // tile_n
    kernel = functools.partial(
        _softmax_dim0_two_pass_kernel, n_row_tiles=n_row_tiles
    )

    def x_map(j, t):
        # both sweeps walk the row tiles in order
        return (t % n_row_tiles, j)

    def o_map(j, t):
        # stay parked on row block 0 during sweep 1 (no output yet); only the
        # correct write at t == n_row_tiles is ever flushed for that block.
        return (jnp.maximum(t - n_row_tiles, 0), j)

    return pl.pallas_call(
        kernel,
        out_shape=jax.ShapeDtypeStruct((n, c), x.dtype),
        grid_spec=pltpu.PrefetchScalarGridSpec(
            num_scalar_prefetch=0,
            grid=(c // tile_c, 2 * n_row_tiles),
            in_specs=[pl.BlockSpec((tile_n, tile_c), x_map)],
            out_specs=pl.BlockSpec((tile_n, tile_c), o_map),
            scratch_shapes=[pltpu.VMEM((1, tile_c), jnp.float32)],
        ),
        compiler_params=pltpu.CompilerParams(
            dimension_semantics=("parallel", "arbitrary"),
            vmem_limit_bytes=_vmem_limit(per_step_bytes),
        ),
    )(x)


def softmax_dim0(x: jax.Array, *, vmem_budget_bytes: int = 20 * 1024 * 1024):
    """exp(x) / sum(exp(x), axis=0), matching the PyTorch module."""
    assert x.ndim == 2, "kernel expects 2-D input [dim0, dim1]"
    n, c = x.shape
    itemsize = jnp.dtype(x.dtype).itemsize
    # Per-column VMEM cost with the whole reduction axis resident:
    #   2x double-buffered input + 2x double-buffered output + ~2 f32 temps.
    per_col_bytes = n * (4 * itemsize + 8)

    # --- Path 1: full-row residency, grid over column tiles only -------------
    max_cols = min(vmem_budget_bytes // per_col_bytes, _MAX_TILE_C)
    tile_c = _pick_col_tile(c, max_cols)
    if tile_c is not None:
        if tile_c == c and n * c * itemsize > (1 << 20):
            # Big-but-fits arrays: split columns into >=2 (ideally 4) parallel
            # tiles so both v7x TensorCores get work.  Tiny arrays (the demo)
            # stay a single grid step: per-step overhead dominates there.
            for parts in (4, 2):
                if c % (parts * _LANE) == 0:
                    tile_c = c // parts
                    break
        return _softmax_single_pass(x, tile_c, per_col_bytes)

    # --- Path 2: reduction axis too tall -> two-pass tiled reduction ---------
    if c % _LANE == 0 and n % _SUBLANE == 0:
        per_row_bytes = _LANE * (4 * itemsize + 8)  # per row at tile_c = 128
        tile_n = (min(n, max(vmem_budget_bytes // per_row_bytes, _SUBLANE))
                  // _SUBLANE) * _SUBLANE
        while tile_n > _SUBLANE and n % tile_n != 0:
            tile_n -= _SUBLANE
        if n % tile_n == 0:
            return _softmax_two_pass(x, tile_n, _LANE, per_row_bytes * tile_n)

    # TODO(synk): shapes not expressible with aligned tiles (c % 128 != 0 and
    # too wide for one block, or n % 8 != 0 on the tall path) fall back to
    # plain XLA, which fuses this fine at such sizes.
    ex = jnp.exp(x.astype(jnp.float32))
    return (ex / jnp.sum(ex, axis=0, keepdims=True)).astype(x.dtype)


if __name__ == "__main__":
    key = jax.random.PRNGKey(0)
    k1, k2 = jax.random.split(key)

    # Shape implied by the module's forward: 2-D [dim0, dim1], softmax over dim0.
    x = jax.random.normal(k1, (8, 256), dtype=jnp.float32)
    y = softmax_dim0(x)
    jax.block_until_ready(y)
    y_ref = jnp.exp(x) / jnp.sum(jnp.exp(x), axis=0)
    assert y.shape == x.shape and y.dtype == x.dtype
    assert jnp.allclose(y, y_ref, atol=2e-3, rtol=2e-3), float(
        jnp.max(jnp.abs(y - y_ref)))

    # Exercise the tall-matrix two-pass path by forcing a tiny VMEM budget.
    x2 = jax.random.normal(k2, (256, 256), dtype=jnp.float32)
    y2 = softmax_dim0(x2, vmem_budget_bytes=96 * 1024)
    jax.block_until_ready(y2)
    y2_ref = jnp.exp(x2) / jnp.sum(jnp.exp(x2), axis=0)
    assert jnp.allclose(y2, y2_ref, atol=2e-3, rtol=2e-3), float(
        jnp.max(jnp.abs(y2 - y2_ref)))

    print("KERNEL_OK")
</pallas_src>

<mosaic_0001>
module attributes {stable_mosaic.version = 11 : i64} {
  func.func @_softmax_dim0_kernel(%arg0: i32, %arg1: memref<8x256xf32, #tpu.memory_space<vmem>>, %arg2: memref<8x256xf32, #tpu.memory_space<vmem>>) attributes {dimension_semantics = [#tpu.dimension_semantics<parallel>], iteration_bounds = array<i64: 1>, scalar_prefetch = 0 : i64, scratch_operands = 0 : i64, tpu.core_type = #tpu.core_type<tc>, window_params = [{transform_indices = @transform_0, window_bounds = array<i64: 8, 256>}, {transform_indices = @transform_1, window_bounds = array<i64: 8, 256>}]} {
    %c0 = arith.constant 0 : index
    %c0_0 = arith.constant 0 : index
    %0 = vector.load %arg1[%c0, %c0_0] : memref<8x256xf32, #tpu.memory_space<vmem>>, vector<8x256xf32>
    %1 = math.exp %0 : vector<8x256xf32>
    %cst = arith.constant dense<0.000000e+00> : vector<256xf32>
    %2 = vector.multi_reduction <add>, %1, %cst [0] : vector<8x256xf32> to vector<256xf32>
    %3 = vector.shape_cast %2 : vector<256xf32> to vector<1x256xf32>
    %4 = tpu.reciprocal %3 {approx = true} : vector<1x256xf32> -> vector<1x256xf32>
    %5 = vector.broadcast %4 : vector<1x256xf32> to vector<8x256xf32>
    %6 = arith.mulf %1, %5 : vector<8x256xf32>
    %c0_1 = arith.constant 0 : index
    %c0_2 = arith.constant 0 : index
    %7 = vector.load %arg2[%c0_1, %c0_2] : memref<8x256xf32, #tpu.memory_space<vmem>>, vector<8x256xf32>
    tpu.vector_store %arg2[%c0_1, %c0_2], %6 {strides = array<i32>} : memref<8x256xf32, #tpu.memory_space<vmem>>, vector<8x256xf32>,
    return
  }
  func.func @transform_0(%arg0: i32) -> (i32, i32) {
    %c0_i32 = arith.constant 0 : i32
    %c0_i32_0 = arith.constant 0 : i32
    return %c0_i32, %arg0 : i32, i32
  }
  func.func @transform_1(%arg0: i32) -> (i32, i32) {
    %c0_i32 = arith.constant 0 : i32
    %c0_i32_0 = arith.constant 0 : i32
    return %c0_i32, %arg0 : i32, i32
  }
}

</mosaic_0001>

<bundles_post_ra>
// kernel: tpu_custom_call.1
= control target key start
LH: loop header
LB: loop body
LE: loop exit
PB: predicated region body
PF: predicated region fallthrough
CT: control target
= control target key end

     0   :  { %6 = vsyncpa [#allocation3], 0  ;;  %s154_s0 = inlined_call_operand.hbm [shape: f32[8,256], index: 0, kind: input, shape index: {}]   ;;  %s155_s1 = inlined_call_operand.hbm [shape: f32[8,256], index: 1, kind: output, shape index: {}]  }
   0x1   :  { %7 = vsyncpa [#allocation4], 0  ;;  %s118_s6 = smov [#allocation2]   ;;  %s70_s10 = scalar_lea.hbm %s154_s0, 256 }
   0x2   :  { %s14_s7 = sshll.u32 %s118_s6, 4  ;;  %p71_p0 = scmp.ne.s32.totalorder %s154_s0, %s70_s10  ;;  %s15_s7 = int_to_ptr.vmem [resolvable:$true] %s14_s7 }
   0x3   :  { %p74_p1 = scmp.lt.u32.totalorder %s70_s10, %s154_s0 }
   0x5   :  { %p76_p2 = pnand %p74_p1, %p71_p0 }
   0x7   :  { %79 = shalt.err (!%p76_p2)
}
   0x8   :  { %s80_s15 = scalar_lea.vmem %s15_s7, 256  ;;  %p85_p4 = scmp.lt.s32.totalorder %s15_s7, %s15_s7 }
   0x9   :  { %p81_p3 = scmp.ne.s32.totalorder %s15_s7, %s80_s15  ;;  %p86_p5 = scmp.lt.s32.totalorder %s80_s15, %s80_s15 }
   0xb   :  { %p87_p6 = por %p86_p5, %p85_p4 }
   0xd   :  { %p88_p7 = pnand %p87_p6, %p81_p3 }
   0xf   :  { %91 = shalt.err (!%p88_p7)
}
  0x10   :  { %17 = dma.hbm_to_vmem [thread:$0]  %s154_s0, 256, %s15_s7, [#allocation3]  }
  0x11   :  { %114 = dma.done.wait [#allocation3], 256  }
  0x12   :  { %115 = vsyncadd [#allocation3], 4294967040  ;;  %v21_v0 = vld [vmem:[#allocation2] sm:$0xff]  ;;  %v22_v1 = vld [vmem:[#allocation2 + $0x8] sm:$0xff]  ;;  %s119_s0 = smov [#allocation5]  }
  0x13   :  { %v23_v2 = vmul.f32 1.442695, %v21_v0  ;;  %v25_v3 = vmul.f32 1.442695, %v22_v1  ;;  %s51_s18 = sshll.u32 %s119_s0, 4  ;;  %s52_s18 = int_to_ptr.vmem [resolvable:$true] %s51_s18 }
  0x14   :  { %s92_s19 = scalar_lea.vmem %s52_s18, 256  ;;  %p97_p9 = scmp.lt.s32.totalorder %s52_s18, %s52_s18 }
  0x15   :  { %62 = vpow2.f32 %v23_v2  ;;  %p93_p8 = scmp.ne.s32.totalorder %s52_s18, %s92_s19  ;;  %p98_p10 = scmp.lt.s32.totalorder %s92_s19, %s92_s19 }
  0x16   :  { %64 = vpow2.f32 %v25_v3 }
  0x17   :  { %p99_p11 = por %p98_p10, %p97_p9 }
  0x19   :  { %p100_p12 = pnand %p99_p11, %p93_p8 }
  0x1f   :  { %v63_v4 = vpop.eup %62 }
  0x20   :  { %v65_v5 = vpop.eup %64  ;;  %v27_v6 = vrot.slane %v63_v4, 4 }
  0x21   :  { %v33_v7 = vrot.slane %v65_v5, 4 }
  0x22   :  { %v28_v8 = vadd.f32 %v63_v4, %v27_v6 }
  0x23   :  { %v34_v9 = vadd.f32 %v65_v5, %v33_v7 }
  0x24   :  { %v29_v10 = vrot.slane %v28_v8, 2 }
  0x25   :  { %v35_v11 = vrot.slane %v34_v9, 2 }
  0x26   :  { %v30_v12 = vadd.f32 %v29_v10, %v28_v8 }
  0x27   :  { %v36_v13 = vadd.f32 %v35_v11, %v34_v9 }
  0x28   :  { %v31_v14 = vrot.slane %v30_v12, 1 }
  0x29   :  { %v37_v15 = vrot.slane %v36_v13, 1 }
  0x2a   :  { %v32_v16 = vadd.f32 %v31_v14, %v30_v12 }
  0x2b   :  { %v38_v17 = vadd.f32 %v37_v15, %v36_v13 }
  0x2c   :  { %66 = vrcp.f32 %v32_v16 }
  0x2d   :  { %68 = vrcp.f32 %v38_v17 }
  0x36   :  { %v67_v18 = vpop.eup %66 }
  0x37   :  { %v69_v19 = vpop.eup %68  ;;  %v41_v20 = vmul.f32 %v67_v18, %v63_v4 }
  0x38   :  { %v42_v21 = vmul.f32 %v69_v19, %v65_v5 }
  0x39   :  { %43 = vst [vmem:[#allocation5] sm:$0xff] %v41_v20 }
  0x3a   :  { %44 = vst [vmem:[#allocation5 + $0x8] sm:$0xff] %v42_v21 }
  0x3b   :  { %103 = shalt.err (!%p100_p12)
}
  0x3c   :  { %s104_s22 = scalar_lea.hbm %s155_s1, 256 }
  0x3d   :  { %p105_p13 = scmp.ne.s32.totalorder %s155_s1, %s104_s22  ;;  %p108_p0 = scmp.lt.u32.totalorder %s104_s22, %s155_s1 }
  0x3f   :  { %p110_p1 = pnand %p108_p0, %p105_p13 }
  0x41   :  { %113 = shalt.err (!%p110_p1)
}
  0x42   :  { %54 = dma.vmem_to_hbm [thread:$0]  %s52_s18, 256, %s155_s1, [#allocation4]  }
  0x43   :  { %116 = dma.done.wait [#allocation4], 256  }
  0x44   :  { %117 = vsyncadd [#allocation4], 4294967040 }
  0x45   :  { %58 = vsyncpa [#allocation3], 1 }
  0x46   :  { %59 = vsyncpa [#allocation4], 1 }

</bundles_post_ra>
